<compile_context>
chip_gen: v7x
topology: tpu7x:2x2x1
jax: 0.10.0
libtpu: 0.0.40
codegen_flags: <defaults>
</compile_context>

<pallas_src>
import jax
import jax.numpy as jnp
from jax.experimental import pallas as pl
from jax.experimental.pallas import tpu as pltpu


_LANE = 128
_TARGET_BLOCK_BYTES = 4 << 20   # ~4 MiB/block: good for v5e/v6e/v7x per review


def _round_up(v, m):
    return ((v + m - 1) // m) * m


def _shuffle_copy_kernel(x_ref, o_ref):
    # x_ref: (nb, 1, c_tile, HW)  dense slab of one group's channels.
    # o_ref: (nb, c_tile, HW)     same rows; the channel permutation is realized
    #                             entirely by the output DMA (index_map).
    o_ref[...] = x_ref[:, 0, :, :]


def channel_shuffle(x, groups):
    """ChannelShuffle forward: x (N, C, H, W) NCHW -> (N, C, H, W)."""
    n, c, h, w = x.shape
    assert c % groups == 0, "channels must be divisible by groups"
    cpg = c // groups
    if groups == 1 or cpg == 1:
        return x                                      # identity permutation
    hw = h * w
    if n == 0 or hw == 0:
        return x                                      # empty tensor

    itemsize = jnp.dtype(x.dtype).itemsize
    sub_tile = max(8, 32 // itemsize)                 # 8 f32, 16 bf16, 32 int8

    # ---- block sizing from (VMEM-padded) footprints -------------------------
    row_vmem = _round_up(hw, _LANE) * itemsize        # one channel row in VMEM
    group_vmem = _round_up(cpg, sub_tile) * row_vmem  # one full group slab
    if group_vmem <= _TARGET_BLOCK_BYTES:
        c_tile = cpg                                  # full dim -> always legal
        nb = min(n, max(1, _TARGET_BLOCK_BYTES // group_vmem))
    else:
        nb = 1
        c_tile = max(sub_tile,
                     (_TARGET_BLOCK_BYTES // row_vmem) // sub_tile * sub_tile)
        c_tile = min(c_tile, cpg)                     # multiple of sub_tile or cpg
    blk_vmem = nb * _round_up(c_tile, sub_tile) * row_vmem
    # Need-based VMEM budget: double-buffered in + out blocks plus headroom.
    vmem_limit = int(max(16 << 20, 4 * blk_vmem + (4 << 20)))

    grid = (pl.cdiv(n, nb), groups, pl.cdiv(cpg, c_tile))

    x4 = x.reshape(n, groups, cpg, hw)                # contiguous (free) view
    in_spec = pl.BlockSpec((nb, 1, c_tile, hw),
                           lambda b, gi, t: (b, gi, t, 0))

    if hw % _LANE == 0:
        # Fully aligned path: output viewed (N, cpg, g*HW); trailing block dims
        # (c_tile, HW) are sublane/lane aligned -> unmasked, lane-dense stores.
        out_shape = jax.ShapeDtypeStruct((n, cpg, groups * hw), x.dtype)
        out_spec = pl.BlockSpec((nb, c_tile, hw),
                                lambda b, gi, t: (b, t, gi))
    else:
        # General path: output viewed (N, cpg, g, HW); the group axis is a
        # squeezed size-1 block dim, so the shuffle is a strided output DMA of
        # whole HW rows and both VMEM buffers stay dense (c_tile, HW) slabs.
        out_shape = jax.ShapeDtypeStruct((n, cpg, groups, hw), x.dtype)
        out_spec = pl.BlockSpec((nb, c_tile, pl.Squeezed(), hw),
                                lambda b, gi, t: (b, t, gi, 0))

    out = pl.pallas_call(
        _shuffle_copy_kernel,
        out_shape=out_shape,
        grid_spec=pltpu.PrefetchScalarGridSpec(
            num_scalar_prefetch=0,
            grid=grid,
            in_specs=[in_spec],
            out_specs=out_spec,
        ),
        compiler_params=pltpu.CompilerParams(
            dimension_semantics=("parallel", "parallel", "parallel"),
            vmem_limit_bytes=vmem_limit,
        ),
        cost_estimate=pl.CostEstimate(
            flops=0,
            transcendentals=0,
            bytes_accessed=int(2 * x.size * itemsize),
        ),
    )(x4)

    # Output memory order is (N, cpg, g, HW) -> channel j = i*g + gi, which is
    # exactly the shuffled order; both reshapes below are free.
    return out.reshape(n, c, h, w)


def _reference_channel_shuffle(x, groups):
    n, c, h, w = x.shape
    y = x.reshape(n, groups, c // groups, h, w)
    y = jnp.transpose(y, (0, 2, 1, 3, 4))
    return y.reshape(n, c, h, w)


if __name__ == "__main__":
    key = jax.random.PRNGKey(0)
    n, c, h, w = 2, 4, 16, 16
    groups = 2

    x = jax.random.normal(key, (n, c, h, w), dtype=jnp.float32)

    y = channel_shuffle(x, groups)
    y = jax.block_until_ready(y)

    y_ref = _reference_channel_shuffle(x, groups)
    assert y.shape == (n, c, h, w)
    assert jnp.array_equal(y, y_ref), "mismatch vs reference channel shuffle"

    print("KERNEL_OK")
</pallas_src>

<mosaic_0001>
module attributes {stable_mosaic.version = 11 : i64} {
  func.func @_shuffle_copy_kernel(%arg0: i32, %arg1: i32, %arg2: i32, %arg3: memref<2x1x2x256xf32, #tpu.memory_space<vmem>>, %arg4: memref<2x2x256xf32, #tpu.memory_space<vmem>>) attributes {dimension_semantics = [#tpu.dimension_semantics<parallel>, #tpu.dimension_semantics<parallel>, #tpu.dimension_semantics<parallel>], iteration_bounds = array<i64: 1, 2, 1>, scalar_prefetch = 0 : i64, scratch_operands = 0 : i64, tpu.core_type = #tpu.core_type<tc>, window_params = [{transform_indices = @transform_0, window_bounds = array<i64: 2, 1, 2, 256>}, {transform_indices = @transform_1, window_bounds = array<i64: 2, 2, 256>}]} {
    %c0 = arith.constant 0 : index
    %c0_0 = arith.constant 0 : index
    %c0_1 = arith.constant 0 : index
    %c0_2 = arith.constant 0 : index
    %0 = vector.load %arg3[%c0, %c0_0, %c0_1, %c0_2] : memref<2x1x2x256xf32, #tpu.memory_space<vmem>>, vector<2x1x2x256xf32>
    %1 = vector.shape_cast %0 : vector<2x1x2x256xf32> to vector<2x2x256xf32>
    %c0_3 = arith.constant 0 : index
    %c0_4 = arith.constant 0 : index
    %c0_5 = arith.constant 0 : index
    %2 = vector.load %arg4[%c0_3, %c0_4, %c0_5] : memref<2x2x256xf32, #tpu.memory_space<vmem>>, vector<2x2x256xf32>
    tpu.vector_store %arg4[%c0_3, %c0_4, %c0_5], %1 {strides = array<i32>} : memref<2x2x256xf32, #tpu.memory_space<vmem>>, vector<2x2x256xf32>,
    return
  }
  func.func @transform_0(%arg0: i32, %arg1: i32, %arg2: i32) -> (i32, i32, i32, i32) {
    %c0_i32 = arith.constant 0 : i32
    %c0_i32_0 = arith.constant 0 : i32
    return %arg0, %arg1, %arg2, %c0_i32 : i32, i32, i32, i32
  }
  func.func @transform_1(%arg0: i32, %arg1: i32, %arg2: i32) -> (i32, i32, i32) {
    %c0_i32 = arith.constant 0 : i32
    return %arg0, %arg2, %arg1 : i32, i32, i32
  }
}

</mosaic_0001>

<bundles_post_ra>
// kernel: tpu_custom_call.1
= control target key start
LH: loop header
LB: loop body
LE: loop exit
PB: predicated region body
PF: predicated region fallthrough
CT: control target
= control target key end

     0   :  { %6 = vsyncpa [#allocation3], 0  ;;  %s677_s0 = inlined_call_operand.hbm [shape: f32[2,2,2,256], index: 0, kind: input, shape index: {}]   ;;  %s678_s1 = inlined_call_operand.hbm [shape: f32[2,2,512], index: 1, kind: output, shape index: {}]  }
   0x1   :  { %8 = vsyncpa [#allocation3 + $0x1], 0 }
   0x2   :  { %9 = vsyncpa [#allocation4], 0 }
   0x3   :  { %11 = vsyncpa [#allocation4 + $0x1], 0  ;;  %s504_s6 = smov 0   ;;  %s506_s7 = smov 0  }
   0x4   :  { %s508_s8 = smov 0   ;;  %s510_s9 = smov 0  }
   0x5   :  { %s512_s10 = smov 0   ;;  %s514_s11 = smov 0  }
   0x6 LB: > { %s287_s12 = sadd.s32 4294967295, %s484_s11   ;;  %s288_s13 = sadd.s32 4294967294, %s484_s11   ;;  %s484_s11 = sphi %s514_s11, %s17_s11   ;;  %s480_s10 = sphi %s512_s10, %s692_s10   ;;  %s476_s9 = sphi %s510_s9, %s691_s9   ;;  %s472_s8 = sphi %s508_s8, %s690_s8   ;;  %s468_s7 = sphi %s506_s7, %s689_s7   ;;  %s464_s6 = sphi %s504_s6, %s688_s6  }
   0x7   : > { %s32_s14 = sadd.s32 1, %s480_s10  ;;  %s47_s15 = sadd.s32 1, %s472_s8 }
   0x8   : > { %p34_p0 = scmp.ge.s32.totalorder %s32_s14, 2  ;;  %p54_p1 = scmp.ne.s32.totalorder %s472_s8, %s468_s7 }
   0x9   : > { %p55_p2 = scmp.eq.s32.totalorder %s484_s11, 0  ;;  %p60_p3 = scmp.ne.s32.totalorder %s468_s7, %s464_s6 }
   0xa   : > { %s694_s14 = smov (%p34_p0, %s32_s14), 0  ;;  %p61_p5 = scmp.eq.s32.totalorder %s287_s12, 0 }
   0xb   : > { %p545_p4 = por %p55_p2, %p54_p1  ;;  %s41_s17 = ssub.s32 %s480_s10, %s694_s14 }
   0xc   : > { %p88_p6 = scmp.eq.s32.totalorder %s287_s12, 1  ;;  %p45_p7 = scmp.eq.s32.totalorder %s41_s17, 0 }
   0xd   : > { %p551_p8 = por %p61_p5, %p60_p3  ;;  %p94_p10 = scmp.eq.s32.totalorder %s288_s13, 1 }
   0xe   : > { %p555_p9 = por %p88_p6, %p54_p1  ;;  %p316_p13 = scmp.lt.s32.totalorder %s484_s11, 2 }
   0xf   : > { %s560_s20 = scalar_select %p45_p7, %s472_s8, %s47_s15  }
  0x10   : > { %s682_s19 = scalar_select %p555_p9, 1, 0 }
  0x11   : > { %p562_p11 = por %p94_p10, %p60_p3  ;;  %s114_s22 = sand.u32 1, %s472_s8  }
  0x12   : > { %s291_s23 = sshll.u32 %s114_s22, 3  ;;  %s302_s24 = sshll.u32 %s480_s10, 6 }
  0x13   : > { %s683_s21 = scalar_select %p562_p11, 1, 0 }
  0x14   : > { %s573_s27 = scalar_lea.hbm %s677_s0, %s302_s24  ;;  %s118_s28 = scalar_lea.vmem [#allocation2], %s291_s23 }
  0x15   : > { %s130_s29 = sshll.u32 %s118_s28, 4  ;;  %p579_p0 = pnand %p316_p13, %p545_p4  ;;  %s575_s29 = int_to_ptr.vmem [resolvable:$true] %s130_s29 }
  0x16   : > { %s583_s2 = scalar_lea.sflag [#allocation3], %s114_s22  ;;  %s372_s3 = scalar_lea.hbm %s573_s27, 128 }
  0x17   : > { %p373_p1 = scmp.ne.s32.totalorder %s573_s27, %s372_s3  ;;  %p374_p2 = pneg %p579_p0 }
  0x18   : > { %s377_s12 = scalar_lea.hbm %s677_s0, 256  ;;  %p378_p4 = scmp.lt.u32.totalorder %s573_s27, %s677_s0 }
  0x19   : > { %p375_p3 = pnand %p374_p2, %p373_p1  ;;  %p379_p6 = scmp.lt.u32.totalorder %s377_s12, %s372_s3 }
  0x1a   : > { %p381_p10 = scmp.lt.u32.totalorder %s372_s3, %s573_s27 }
  0x1b   : > { %p376_p5 = pneg %p375_p3  ;;  %p380_p7 = por %p379_p6, %p378_p4 }
  0x1d   : > { %p382_p13 = por %p381_p10, %p380_p7 }
  0x1f   : > { %p383_p12 = pnand %p382_p13, %p376_p5 }
  0x21   : > { %386 = shalt.err (!%p383_p12)
}
  0x22   : > { %s387_s16 = scalar_lea.vmem %s575_s29, 128  ;;  %s486_s17 = smov [#allocation2]  }
  0x23   : > { %p388_p1 = scmp.ne.s32.totalorder %s575_s29, %s387_s16  ;;  %s392_s22 = sshll.u32 %s486_s17, 4  ;;  %s393_s22 = int_to_ptr.vmem [resolvable:$false] %s392_s22 }
  0x24   : > { %s394_s23 = scalar_lea.vmem %s393_s22, 256  ;;  %p395_p9 = scmp.lt.s32.totalorder %s575_s29, %s393_s22 }
  0x25   : > { %p390_p3 = pnand %p388_p1, %p374_p2  ;;  %p396_p4 = scmp.lt.s32.totalorder %s394_s23, %s387_s16 }
  0x27   : > { %p391_p11 = pneg %p390_p3  ;;  %p397_p6 = por %p396_p4, %p395_p9 }
  0x29   : > { %p398_p7 = pnand %p397_p6, %p391_p11 }
  0x2b   : > { %401 = shalt.err (!%p398_p7)
}
  0x2c   : > { %s487_s24 = smov 128   ;;  %s488_s25 = smov 64  }
  0x2d   : > { %s489_s26 = smov 4   ;;  %p294_p12 = scmp.ge.s32.totalorder %s484_s11, 1 }
  0x2e   : > { %311 = dma.hbm_to_vmem [thread:$0]  (!%p579_p0), %s573_s27, 128, %s575_s29, %s583_s2, %s487_s24, %s488_s25, %s489_s26  }
  0x2f   : > { %p138_p2 = scmp.lt.s32.totalorder %s484_s11, 3 }
  0x31   : > { %p139_p5 = pnand %p294_p12, %p138_p2 }
  0x32   : > { %s614_s28 = sand.u32 (!%p139_p5), 1, %s468_s7  }
  0x33   : > { %142 = sbr.rel (%p139_p5) target bundleno = 87 (0x57), region = 24  ;;  %s295_s3 = sshll.u32 (!%p139_p5), %s614_s28, 3 }
  0x34   : > { %s145_s4 = scalar_lea.sflag (!%p139_p5), [#allocation3], %s614_s28  ;;  %s148_s5 = scalar_lea.vmem (!%p139_p5), [#allocation2], %s295_s3 }
  0x3a   : > { %455 = dma.done.wait (%p551_p8), %s145_s4, 128  }
  0x3b   : > { %457 = vsyncadd (%p551_p8), %s145_s4, 4294967168  ;;  %s166_s27 = scalar_lea.vmem [#allocation5], %s295_s3  ;;  %s303_s30 = sshll.u32 %s476_s9, 6  ;;  %v170_v0 = vld [vmem:[%s148_s5] sm:$0xff]  }
  0x3c   : > { %s193_s29 = sshll.u32 %s166_s27, 4  ;;  %s628_s13 = scalar_lea.hbm %s678_s1, %s303_s30  ;;  %172 = vst [vmem:[%s166_s27] sm:$0xff] %v170_v0   ;;  %s623_s29 = int_to_ptr.vmem [resolvable:$true] %s193_s29 }
  0x3d   : > { %s175_s18 = scalar_lea.sflag [#allocation4], %s614_s28  ;;  %s402_s15 = scalar_lea.vmem %s623_s29, 128 }
  0x3e   : > { %p403_p8 = scmp.ne.s32.totalorder %s623_s29, %s402_s15  ;;  %p685_p9 = scmp.ne.s32.totalorder %s682_s19, 0 }
  0x3f   : > { %s490_s16 = smov [#allocation5]  }
  0x40   : > { %p404_p11 = pnand %p403_p8, %p685_p9  ;;  %s406_s9 = sshll.u32 %s490_s16, 4  ;;  %s407_s9 = int_to_ptr.vmem [resolvable:$false] %s406_s9 }
  0x41   : > { %s408_s17 = scalar_lea.vmem %s407_s9, 256  ;;  %p409_p10 = scmp.lt.s32.totalorder %s623_s29, %s407_s9 }
  0x42   : > { %p405_p0 = pneg %p404_p11  ;;  %p410_p13 = scmp.lt.s32.totalorder %s408_s17, %s402_s15 }
  0x44   : > { %p411_p1 = por %p410_p13, %p409_p10 }
  0x46   : > { %p412_p3 = pnand %p411_p1, %p405_p0 }
  0x48   : > { %415 = shalt.err (!%p412_p3)
}
  0x49   : > { %s416_s22 = scalar_lea.hbm %s628_s13, 128  ;;  %s420_s25 = scalar_lea.hbm %s678_s1, 256 }
  0x4a   : > { %p417_p4 = scmp.ne.s32.totalorder %s628_s13, %s416_s22  ;;  %p421_p12 = scmp.lt.u32.totalorder %s628_s13, %s678_s1 }
  0x4b   : > { %p422_p2 = scmp.lt.u32.totalorder %s420_s25, %s416_s22  ;;  %p424_p8 = scmp.lt.u32.totalorder %s416_s22, %s628_s13 }
  0x4c   : > { %p418_p6 = pnand %p417_p4, %p685_p9 }
  0x4d   : > { %p423_p5 = por %p422_p2, %p421_p12 }
  0x4e   : > { %p419_p7 = pneg %p418_p6 }
  0x4f   : > { %p425_p11 = por %p424_p8, %p423_p5 }
  0x51   : > { %p426_p0 = pnand %p425_p11, %p419_p7 }
  0x53   : > { %429 = shalt.err (!%p426_p0)
}
  0x54   : > { %s491_s4 = smov 64   ;;  %s492_s5 = smov 128  }
  0x55   : > { %s493_s27 = smov 4  }
  0x56   : > { %306 = dma.vmem_to_hbm [thread:$0]  (%p685_p9), %s623_s29, 128, %s628_s13, %s175_s18, %s491_s4, %s492_s5, %s493_s27  }
  0x57 PF: > { %s208_s30 = sand.u32 1, %s464_s6   ;;  %p686_p10 = scmp.ne.s32.totalorder %s683_s21, 0 }
  0x58   : > { %p687_p13 = scmp.ge.s32.totalorder %s484_s11, 2  ;;  %s209_s2 = scalar_lea.sflag [#allocation4], %s208_s30 }
  0x5a   : > { %p313_p1 = pnand %p687_p13, %p686_p10 }
  0x5c   : > { %459 = dma.done.wait (!%p313_p1), %s209_s2, 128  }
  0x5d   : > { %461 = vsyncadd (!%p313_p1), %s209_s2, 4294967168  ;;  %s17_s11 = sadd.s32 1, %s484_s11   ;;  %s688_s6 = smov %s468_s7 }
  0x5e   : > { %p14_p3 = scmp.ge.s32.totalorder %s17_s11, 4   ;;  %s689_s7 = smov %s472_s8 }
  0x5f   : > { %s690_s8 = smov %s560_s20  ;;  %s691_s9 = smov %s480_s10 }
  0x60   : > { %s692_s10 = smov %s694_s14  ;;  %16 = sbr.rel (!%p14_p3) target bundleno = 6 (0x6), region = 69 }
  0x67   :  { %214 = vsyncpa [#allocation3], 1 }
  0x68   :  { %216 = vsyncpa [#allocation3 + $0x1], 1 }
  0x69   :  { %217 = vsyncpa [#allocation4], 1 }
  0x6a   :  { %219 = vsyncpa [#allocation4 + $0x1], 1 }

</bundles_post_ra>
